<compile_context>
chip_gen: v6e
topology: v6e:2x2x1
jax: 0.10.0
libtpu: 0.0.40
codegen_flags: <defaults>
</compile_context>

<pallas_src>
import jax
import jax.numpy as jnp
from jax.experimental import pallas as pl
from jax.experimental.pallas import tpu as pltpu

H_PAD = 128     # hidden 32 -> padded to one full lane width (exact: pads are 0)
TILE_M = 1024   # batch tile upper bound (rows per grid step)


def _round_up(n, m):
    return ((n + m - 1) // m) * m


def _pad_to(a, shape):
    return jnp.pad(a, [(0, t - s) for s, t in zip(a.shape, shape)])


def dqn_kernel(x_ref, w1_ref, b1_ref, w2_ref, b2_ref, w3_ref, b3_ref, o_ref):
    out_dim = o_ref.shape[1]

    # ---- Layer 1 on the VPU (K = in_dim is tiny; an MXU pass is pure latency).
    x = x_ref[...]                      # (tm, in_dim) f32
    w1 = w1_ref[...]                    # (in_dim, H_PAD) f32
    h1 = b1_ref[...]                    # (1, H_PAD) f32, broadcasts over rows
    for k in range(x.shape[1]):         # unrolled, in_dim = 4
        h1 = h1 + x[:, k:k + 1] * w1[k:k + 1, :]
    h1 = jnp.maximum(h1, 0.0).astype(jnp.bfloat16)

    # ---- Layers 2-3 on the MXU (bf16 inputs, f32 accumulation).
    h2 = jnp.dot(h1, w2_ref[...], preferred_element_type=jnp.float32) + b2_ref[...]
    h2 = jnp.maximum(h2, 0.0).astype(jnp.bfloat16)
    q = jnp.dot(h2, w3_ref[...], preferred_element_type=jnp.float32)  # (tm, H_PAD)

    # Only the first out_dim lanes are meaningful; store them directly
    # (narrow masked store beats writing a 128-lane padded slab + slicing).
    o_ref[...] = q[:, :out_dim] + b3_ref[...]


def _choose_tile(B, tile_m=TILE_M):
    Bp = _round_up(max(B, 8), 8)        # sublane multiple
    tm = min(tile_m, Bp)
    # Guarantee >= 2 grid steps when batch permits so v7x megacore can split.
    if Bp // tm < 2 and Bp >= 16:
        tm = _round_up(pl.cdiv(Bp, 2), 8)
    Bp = _round_up(Bp, tm)
    return tm, Bp


def dqn_forward(x, padded_params, *, tile_m=TILE_M):
    """x: [B, in_dim] float32. Returns [B, out_dim] float32 Q-values."""
    B, in_dim = x.shape
    out_dim = padded_params["out_dim"]

    tm, Bp = _choose_tile(B, tile_m)
    if Bp != B:
        x = jnp.pad(x, ((0, Bp - B), (0, 0)))
    grid = (Bp // tm,)

    def const(shape):
        # Weights/biases: same block every grid step -> stay VMEM-resident.
        return pl.BlockSpec(shape, lambda i: (0, 0))

    out = pl.pallas_call(
        dqn_kernel,
        out_shape=jax.ShapeDtypeStruct((Bp, out_dim), jnp.float32),
        grid=grid,
        in_specs=[
            pl.BlockSpec((tm, in_dim), lambda i: (i, 0)),   # x: tiled over batch
            const((in_dim, H_PAD)), const((1, H_PAD)),      # W1, b1 (f32, VPU layer)
            const((H_PAD, H_PAD)), const((1, H_PAD)),       # W2 (bf16), b2 (f32)
            const((H_PAD, H_PAD)), const((1, out_dim)),     # W3 (bf16), b3 (f32)
        ],
        out_specs=pl.BlockSpec((tm, out_dim), lambda i: (i, 0)),
        compiler_params=pltpu.CompilerParams(
            dimension_semantics=("parallel",),               # megacore split on v7x
        ),
    )(
        x,
        padded_params["w1"], padded_params["b1"],
        padded_params["w2"], padded_params["b2"],
        padded_params["w3"], padded_params["b3"],
    )
    return out[:B] if Bp != B else out


def init_params(key, in_dim, hidden, out_dim):
    """Kaiming-uniform-ish init (like nn.Linear). Returns (logical, padded)."""
    ks = jax.random.split(key, 6)

    def linear(kw, kb, fan_in, fan_out):
        bound = 1.0 / jnp.sqrt(fan_in)
        w = jax.random.uniform(kw, (fan_in, fan_out), jnp.float32, -bound, bound)
        b = jax.random.uniform(kb, (1, fan_out), jnp.float32, -bound, bound)
        return w, b

    w1, b1 = linear(ks[0], ks[1], in_dim, hidden)
    w2, b2 = linear(ks[2], ks[3], hidden, hidden)
    w3, b3 = linear(ks[4], ks[5], hidden, out_dim)
    logical = {"w1": w1, "b1": b1, "w2": w2, "b2": b2, "w3": w3, "b3": b3}

    # Zero-pad hidden dims to 128 lanes (numerically exact). Layer-1 weights
    # stay f32 (VPU path); layers 2-3 weights are bf16 (MXU path). Biases f32.
    padded = {
        "w1": _pad_to(w1, (in_dim, H_PAD)),
        "b1": _pad_to(b1, (1, H_PAD)),
        "w2": _pad_to(w2, (H_PAD, H_PAD)).astype(jnp.bfloat16),
        "b2": _pad_to(b2, (1, H_PAD)),
        "w3": _pad_to(w3, (H_PAD, H_PAD)).astype(jnp.bfloat16),
        "b3": b3,                       # added after slicing to out_dim lanes
        "out_dim": out_dim,
    }
    return logical, padded


def dqn_reference(x, p):
    """Pure-JAX reference matching the kernel's math (f32 layer 1, bf16 MXU)."""
    h1 = jnp.maximum(jnp.dot(x, p["w1"]) + p["b1"], 0.0).astype(jnp.bfloat16)
    w2 = p["w2"].astype(jnp.bfloat16)
    w3 = p["w3"].astype(jnp.bfloat16)
    h2 = jnp.maximum(
        jnp.dot(h1, w2, preferred_element_type=jnp.float32) + p["b2"], 0.0
    ).astype(jnp.bfloat16)
    return jnp.dot(h2, w3, preferred_element_type=jnp.float32) + p["b3"]


if __name__ == "__main__":
    # Module spec: DQN(in_features=(4,), out_features=4); hidden = 32.
    IN_DIM, HIDDEN, OUT_DIM = 4, 32, 4

    key = jax.random.PRNGKey(0)
    k_x, k_x2, k_p = jax.random.split(key, 3)
    logical, padded = init_params(k_p, IN_DIM, HIDDEN, OUT_DIM)

    # Throughput-shaped batch (fills MXU sublanes; grid=(2,) so v7x can split).
    B = 256
    x = jax.random.normal(k_x, (B, IN_DIM), dtype=jnp.float32)
    out = jax.block_until_ready(dqn_forward(x, padded))
    ref = dqn_reference(x, logical)
    assert out.shape == (B, OUT_DIM)
    assert jnp.allclose(out, ref, atol=1e-2, rtol=1e-2), "mismatch vs reference (B=256)"

    # Small / odd batch still works (internally padded to a sublane multiple).
    x2 = jax.random.normal(k_x2, (8, IN_DIM), dtype=jnp.float32)
    out2 = jax.block_until_ready(dqn_forward(x2, padded))
    ref2 = dqn_reference(x2, logical)
    assert out2.shape == (8, OUT_DIM)
    assert jnp.allclose(out2, ref2, atol=1e-2, rtol=1e-2), "mismatch vs reference (B=8)"

    print("KERNEL_OK")
</pallas_src>

<mosaic_0001>
module attributes {stable_mosaic.version = 11 : i64} {
  func.func @dqn_kernel(%arg0: i32, %arg1: memref<128x4xf32, #tpu.memory_space<vmem>>, %arg2: memref<4x128xf32, #tpu.memory_space<vmem>>, %arg3: memref<1x128xf32, #tpu.memory_space<vmem>>, %arg4: memref<128x128xbf16, #tpu.memory_space<vmem>>, %arg5: memref<1x128xf32, #tpu.memory_space<vmem>>, %arg6: memref<128x128xbf16, #tpu.memory_space<vmem>>, %arg7: memref<1x4xf32, #tpu.memory_space<vmem>>, %arg8: memref<128x4xf32, #tpu.memory_space<vmem>>) attributes {dimension_semantics = [#tpu.dimension_semantics<parallel>], iteration_bounds = array<i64: 2>, scalar_prefetch = 0 : i64, scratch_operands = 0 : i64, tpu.core_type = #tpu.core_type<tc>, window_params = [{transform_indices = @transform_0, window_bounds = array<i64: 128, 4>}, {pipeline_mode = #tpu.pipeline_mode<synchronous>, transform_indices = @transform_1, window_bounds = array<i64: 4, 128>}, {pipeline_mode = #tpu.pipeline_mode<synchronous>, transform_indices = @transform_2, window_bounds = array<i64: 1, 128>}, {pipeline_mode = #tpu.pipeline_mode<synchronous>, transform_indices = @transform_3, window_bounds = array<i64: 128, 128>}, {pipeline_mode = #tpu.pipeline_mode<synchronous>, transform_indices = @transform_4, window_bounds = array<i64: 1, 128>}, {pipeline_mode = #tpu.pipeline_mode<synchronous>, transform_indices = @transform_5, window_bounds = array<i64: 128, 128>}, {pipeline_mode = #tpu.pipeline_mode<synchronous>, transform_indices = @transform_6, window_bounds = array<i64: 1, 4>}, {transform_indices = @transform_7, window_bounds = array<i64: 128, 4>}]} {
    %c0 = arith.constant 0 : index
    %c0_0 = arith.constant 0 : index
    %0 = vector.load %arg1[%c0, %c0_0] : memref<128x4xf32, #tpu.memory_space<vmem>>, vector<128x4xf32>
    %c0_1 = arith.constant 0 : index
    %c0_2 = arith.constant 0 : index
    %1 = vector.load %arg2[%c0_1, %c0_2] : memref<4x128xf32, #tpu.memory_space<vmem>>, vector<4x128xf32>
    %c0_3 = arith.constant 0 : index
    %c0_4 = arith.constant 0 : index
    %2 = vector.load %arg3[%c0_3, %c0_4] : memref<1x128xf32, #tpu.memory_space<vmem>>, vector<1x128xf32>
    %3 = vector.extract_strided_slice %0 {offsets = [0, 0], sizes = [128, 1], strides = [1, 1]} : vector<128x4xf32> to vector<128x1xf32>
    %4 = vector.extract_strided_slice %1 {offsets = [0, 0], sizes = [1, 128], strides = [1, 1]} : vector<4x128xf32> to vector<1x128xf32>
    %5 = vector.broadcast %3 : vector<128x1xf32> to vector<128x128xf32>
    %6 = vector.broadcast %4 : vector<1x128xf32> to vector<128x128xf32>
    %7 = arith.mulf %5, %6 : vector<128x128xf32>
    %8 = vector.broadcast %2 : vector<1x128xf32> to vector<128x128xf32>
    %9 = arith.addf %8, %7 : vector<128x128xf32>
    %10 = vector.extract_strided_slice %0 {offsets = [0, 1], sizes = [128, 1], strides = [1, 1]} : vector<128x4xf32> to vector<128x1xf32>
    %11 = vector.extract_strided_slice %1 {offsets = [1, 0], sizes = [1, 128], strides = [1, 1]} : vector<4x128xf32> to vector<1x128xf32>
    %12 = vector.broadcast %10 : vector<128x1xf32> to vector<128x128xf32>
    %13 = vector.broadcast %11 : vector<1x128xf32> to vector<128x128xf32>
    %14 = arith.mulf %12, %13 : vector<128x128xf32>
    %15 = arith.addf %9, %14 : vector<128x128xf32>
    %16 = vector.extract_strided_slice %0 {offsets = [0, 2], sizes = [128, 1], strides = [1, 1]} : vector<128x4xf32> to vector<128x1xf32>
    %17 = vector.extract_strided_slice %1 {offsets = [2, 0], sizes = [1, 128], strides = [1, 1]} : vector<4x128xf32> to vector<1x128xf32>
    %18 = vector.broadcast %16 : vector<128x1xf32> to vector<128x128xf32>
    %19 = vector.broadcast %17 : vector<1x128xf32> to vector<128x128xf32>
    %20 = arith.mulf %18, %19 : vector<128x128xf32>
    %21 = arith.addf %15, %20 : vector<128x128xf32>
    %22 = vector.extract_strided_slice %0 {offsets = [0, 3], sizes = [128, 1], strides = [1, 1]} : vector<128x4xf32> to vector<128x1xf32>
    %23 = vector.extract_strided_slice %1 {offsets = [3, 0], sizes = [1, 128], strides = [1, 1]} : vector<4x128xf32> to vector<1x128xf32>
    %24 = vector.broadcast %22 : vector<128x1xf32> to vector<128x128xf32>
    %25 = vector.broadcast %23 : vector<1x128xf32> to vector<128x128xf32>
    %26 = arith.mulf %24, %25 : vector<128x128xf32>
    %27 = arith.addf %21, %26 : vector<128x128xf32>
    %cst = arith.constant 0.000000e+00 : f32
    %28 = vector.broadcast %cst : f32 to vector<128x128xf32>
    %29 = arith.maximumf %27, %28 : vector<128x128xf32>
    %30 = arith.truncf %29 : vector<128x128xf32> to vector<128x128xbf16>
    %c0_5 = arith.constant 0 : index
    %c0_6 = arith.constant 0 : index
    %31 = vector.load %arg4[%c0_5, %c0_6] : memref<128x128xbf16, #tpu.memory_space<vmem>>, vector<128x128xbf16>
    %cst_7 = arith.constant dense<0.000000e+00> : vector<128x128xf32>
    %32 = tpu.matmul %30, %31, %cst_7 {dimension_numbers = #tpu.dot_dimension_numbers<[1], [0], [0], [1], [0, 0, 1, 1], [], []>} : vector<128x128xbf16>, vector<128x128xbf16>, vector<128x128xf32> -> vector<128x128xf32>
    %c0_8 = arith.constant 0 : index
    %c0_9 = arith.constant 0 : index
    %33 = vector.load %arg5[%c0_8, %c0_9] : memref<1x128xf32, #tpu.memory_space<vmem>>, vector<1x128xf32>
    %34 = vector.broadcast %33 : vector<1x128xf32> to vector<128x128xf32>
    %35 = arith.addf %32, %34 : vector<128x128xf32>
    %cst_10 = arith.constant 0.000000e+00 : f32
    %36 = vector.broadcast %cst_10 : f32 to vector<128x128xf32>
    %37 = arith.maximumf %35, %36 : vector<128x128xf32>
    %38 = arith.truncf %37 : vector<128x128xf32> to vector<128x128xbf16>
    %c0_11 = arith.constant 0 : index
    %c0_12 = arith.constant 0 : index
    %39 = vector.load %arg6[%c0_11, %c0_12] : memref<128x128xbf16, #tpu.memory_space<vmem>>, vector<128x128xbf16>
    %cst_13 = arith.constant dense<0.000000e+00> : vector<128x128xf32>
    %40 = tpu.matmul %38, %39, %cst_13 {dimension_numbers = #tpu.dot_dimension_numbers<[1], [0], [0], [1], [0, 0, 1, 1], [], []>} : vector<128x128xbf16>, vector<128x128xbf16>, vector<128x128xf32> -> vector<128x128xf32>
    %41 = vector.extract_strided_slice %40 {offsets = [0, 0], sizes = [128, 4], strides = [1, 1]} : vector<128x128xf32> to vector<128x4xf32>
    %c0_14 = arith.constant 0 : index
    %c0_15 = arith.constant 0 : index
    %42 = vector.load %arg7[%c0_14, %c0_15] : memref<1x4xf32, #tpu.memory_space<vmem>>, vector<1x4xf32>
    %43 = vector.broadcast %42 : vector<1x4xf32> to vector<128x4xf32>
    %44 = arith.addf %41, %43 : vector<128x4xf32>
    %c0_16 = arith.constant 0 : index
    %c0_17 = arith.constant 0 : index
    %45 = vector.load %arg8[%c0_16, %c0_17] : memref<128x4xf32, #tpu.memory_space<vmem>>, vector<128x4xf32>
    tpu.vector_store %arg8[%c0_16, %c0_17], %44 {strides = array<i32>} : memref<128x4xf32, #tpu.memory_space<vmem>>, vector<128x4xf32>,
    return
  }
  func.func @transform_0(%arg0: i32) -> (i32, i32) {
    %c0_i32 = arith.constant 0 : i32
    %c0_i32_0 = arith.constant 0 : i32
    return %arg0, %c0_i32 : i32, i32
  }
  func.func @transform_1(%arg0: i32) -> (i32, i32) {
    %c0_i32 = arith.constant 0 : i32
    %c0_i32_0 = arith.constant 0 : i32
    %c0_i32_1 = arith.constant 0 : i32
    return %c0_i32, %c0_i32_0 : i32, i32
  }
  func.func @transform_2(%arg0: i32) -> (i32, i32) {
    %c0_i32 = arith.constant 0 : i32
    %c0_i32_0 = arith.constant 0 : i32
    %c0_i32_1 = arith.constant 0 : i32
    return %c0_i32, %c0_i32_0 : i32, i32
  }
  func.func @transform_3(%arg0: i32) -> (i32, i32) {
    %c0_i32 = arith.constant 0 : i32
    %c0_i32_0 = arith.constant 0 : i32
    %c0_i32_1 = arith.constant 0 : i32
    return %c0_i32, %c0_i32_0 : i32, i32
  }
  func.func @transform_4(%arg0: i32) -> (i32, i32) {
    %c0_i32 = arith.constant 0 : i32
    %c0_i32_0 = arith.constant 0 : i32
    %c0_i32_1 = arith.constant 0 : i32
    return %c0_i32, %c0_i32_0 : i32, i32
  }
  func.func @transform_5(%arg0: i32) -> (i32, i32) {
    %c0_i32 = arith.constant 0 : i32
    %c0_i32_0 = arith.constant 0 : i32
    %c0_i32_1 = arith.constant 0 : i32
    return %c0_i32, %c0_i32_0 : i32, i32
  }
  func.func @transform_6(%arg0: i32) -> (i32, i32) {
    %c0_i32 = arith.constant 0 : i32
    %c0_i32_0 = arith.constant 0 : i32
    %c0_i32_1 = arith.constant 0 : i32
    return %c0_i32, %c0_i32_0 : i32, i32
  }
  func.func @transform_7(%arg0: i32) -> (i32, i32) {
    %c0_i32 = arith.constant 0 : i32
    %c0_i32_0 = arith.constant 0 : i32
    return %arg0, %c0_i32 : i32, i32
  }
}

</mosaic_0001>

<bundles_post_ra>
// kernel: tpu_custom_call.1
= control target key start
LH: loop header
LB: loop body
LE: loop exit
PB: predicated region body
PF: predicated region fallthrough
CT: control target
= control target key end

     0   :  { %s1422_s24 = smov 0   ;;  %s1785_s0 = inlined_call_operand.vmem [shape: f32[256,4], index: 0, kind: input, shape index: {}]   ;;  %s1786_s1 = inlined_call_operand.vmem [shape: f32[4,128], index: 1, kind: input, shape index: {}]   ;;  %s1787_s2 = inlined_call_operand.vmem [shape: f32[1,128], index: 2, kind: input, shape index: {}]   ;;  %s1788_s3 = inlined_call_operand.vmem [shape: bf16[128,128], index: 3, kind: input, shape index: {}]   ;;  %s1789_s4 = inlined_call_operand.vmem [shape: f32[1,128], index: 4, kind: input, shape index: {}]   ;;  %s1790_s5 = inlined_call_operand.vmem [shape: bf16[128,128], index: 5, kind: input, shape index: {}]   ;;  %s1791_s6 = inlined_call_operand.vmem [shape: f32[1,4], index: 6, kind: input, shape index: {}]   ;;  %s1792_s7 = inlined_call_operand.vmem [shape: f32[256,4], index: 7, kind: output, shape index: {}]  }
   0x1 LB: > { %s1196_s25 = sadd.s32 4294967295, %s1376_s24   ;;  %p1200_p0 = scmp.ge.s32.totalorder %s1376_s24, 1  ;;  %s1376_s24 = sphi %s1422_s24, %s17_s24  }
   0x2   : > { %p238_p1 = scmp.lt.s32.totalorder %s1376_s24, 3 }
   0x4   : > { %p239_p2 = pnand %p1200_p0, %p238_p1 }
   0x5   : > { %s1201_s26 = sshll.u32 (!%p239_p2), %s1196_s25, 4 }
   0x6   : > { %242 = sbr.rel (%p239_p2) target bundleno = 722 (0x2d2), region = 48  ;;  %p271_p3 = scmp.lt.s32.totalorder (!%p239_p2), %s1201_s26, 31 }
   0xb   : > { %v1378_v0 = vmov 0   ;;  %s1794_s26 = smov (!%p271_p3, %s1201_s26), 31  ;;  %v1379_v7 = vmov 1   ;;  %v1380_v9 = vmov 2   ;;  %v1381_v11 = vmov 3   ;;  %v1354_v17 = vld [vmem:[%s1788_s3 + $0x38] sm:$0xff]  }
   0xc   : > { %1335 = vset.pattern.permute.xlu1 %v1378_v0  ;;  %1334 = vset.pattern.permute.xlu0 %v1378_v0  ;;  %s1202_s27 = sshll.u32 %s1794_s26, 3  ;;  %v1355_v19 = vld [vmem:[%s1788_s3 + $0x30] sm:$0xff]   ;;  %v1356_v20 = vld [vmem:[%s1788_s3 + $0x28] sm:$0xff]   ;;  %v1357_v21 = vld [vmem:[%s1788_s3 + $0x20] sm:$0xff]   ;;  %v381_v49 = vlaneseq  ;;  %vm1123_vm0 = vcmask 31744  }
   0xd   : > { %s1440_s30 = scalar_lea.vmem %s1785_s0, %s1202_s27  ;;  %1258 = vmatprep.subr.bf16.mxu0 %v1354_v17  ;;  %v1358_v22 = vld [vmem:[%s1788_s3 + $0x18] sm:$0xff]   ;;  %v1359_v23 = vld [vmem:[%s1788_s3 + $0x10] sm:$0xff]   ;;  %v1360_v24 = vld [vmem:[%s1788_s3 + $0x8] sm:$0xff]   ;;  %s1748_s10 = scalar_lea.vmem %s1792_s7, %s1202_s27 }
   0xe   : > { %v285_v1 = vld [vmem:[%s1440_s30 + $0x10] sm:$0xff]  ;;  %v1444_v2 = vld [vmem:[%s1440_s30] sm:$0xff]  ;;  %v1448_v3 = vld [vmem:[%s1440_s30 + $0x18] sm:$0xff]  ;;  %1259 = vmatpush3.bf16.msra.mxu0 %v1354_v17  ;;  %v382_v52 = vshrl.u32 %v381_v49, 7 }
   0xf   : > { %313 = vperm.xlu1 %1335, %v285_v1   ;;  %303 = vperm.xlu0 %1334, %v1444_v2   ;;  %v284_v4 = vld [vmem:[%s1440_s30 + $0x8] sm:$0xff]  ;;  %v287_v10 = vld [vmem:[%s1440_s30 + $0x20] sm:$0xff]  ;;  %v290_v12 = vld [vmem:[%s1440_s30 + $0x38] sm:$0xff] }
  0x10   : > { %v1453_v5 = vld [vmem:[%s1440_s30 + $0x28] sm:$0xff]  ;;  %v1475_v13 = vld [vmem:[%s1440_s30 + $0x40] sm:$0xff]  ;;  %v1479_v14 = vld [vmem:[%s1440_s30 + $0x58] sm:$0xff]  ;;  %1260 = vmatprep.subr.bf16.mxu0 %v1355_v19  ;;  %v383_v57 = vsub.s32 0, %v382_v52  ;;  %v489_v61 = vsub.s32 1, %v382_v52 }
  0x11   : > { %v1456_v6 = vld [vmem:[%s1440_s30 + $0x48] sm:$0xff]  ;;  %v289_v15 = vld [vmem:[%s1440_s30 + $0x30] sm:$0xff]  ;;  %v1485_v16 = vld [vmem:[%s1440_s30 + $0x60] sm:$0xff] }
  0x12   : > { %v1462_v8 = vld [vmem:[%s1440_s30 + $0x68] sm:$0xff]  ;;  %v1492_v18 = vld [vmem:[%s1440_s30 + $0x78] sm:$0xff]  ;;  %1261 = vmatpush3.bf16.msra.mxu0 %v1355_v19  ;;  %v1361_v25 = vld [vmem:[%s1788_s3] sm:$0xff]  }
  0x13   : > { %318 = vperm.xlu1 %1335, %v1448_v3   ;;  %308 = vperm.xlu0 %1334, %v284_v4   ;;  %v293_v26 = vld [vmem:[%s1440_s30 + $0x50] sm:$0xff]  ;;  %v1362_v54 = vld [vmem:[%s1790_s5 + $0x38] sm:$0xff]   ;;  %v1364_v58 = vld [vmem:[%s1790_s5 + $0x28] sm:$0xff]  }
  0x14   : > { %1262 = vmatprep.subr.bf16.mxu0 %v1356_v20  ;;  %v297_v31 = vld [vmem:[%s1440_s30 + $0x70] sm:$0xff]  ;;  %1290 = vmatprep.subr.bf16.mxu1 %v1362_v54  ;;  %v299_v59 = vld [vmem:[%s1786_s1] sm:$0xf] }
  0x15   : > { %v1363_v55 = vld [vmem:[%s1790_s5 + $0x30] sm:$0xff]   ;;  %1291 = vmatpush3.bf16.msra.mxu1 %v1362_v54  ;;  %v1604_v63 = vrot.slane %v299_v59, %v383_v57 }
  0x16   : > { %1263 = vmatpush3.bf16.msra.mxu0 %v1356_v20  ;;  %1292 = vmatprep.subr.bf16.mxu1 %v1363_v55 }
  0x17   : > { %1336 = vset.pattern.permute.xlu1 %v1379_v7  ;;  %328 = vperm.xlu0 %1334, %v1453_v5  }
  0x18   : > { %428 = vperm.xlu1 %1336, %v284_v4   ;;  %1264 = vmatprep.subr.bf16.mxu0 %v1357_v21 }
  0x19   : > { %1293 = vmatpush3.bf16.msra.mxu1 %v1363_v55 }
  0x1a   : > { %1265 = vmatpush3.bf16.msra.mxu0 %v1357_v21  ;;  %1294 = vmatprep.subr.bf16.mxu1 %v1364_v58 }
  0x1b   : > { %348 = vperm.xlu0 %1334, %v1456_v6   ;;  %1266 = vmatprep.subr.bf16.mxu0 %v1358_v22 }
  0x1c   : > { %432 = vperm.xlu1 %1336, %v285_v1  }
  0x1d   : > { %1295 = vmatpush3.bf16.msra.mxu1 %v1364_v58 }
  0x1e   : > { %1267 = vmatpush3.bf16.msra.mxu0 %v1358_v22 }
  0x1f   : > { %368 = vperm.xlu0 %1334, %v1462_v8   ;;  %1268 = vmatprep.subr.bf16.mxu0 %v1359_v23 }
  0x20   : > { %1337 = vset.pattern.permute.xlu1 %v1380_v9 }
  0x21   : > { %524 = vperm.xlu1 %1337, %v1444_v2  }
  0x22   : > { %1269 = vmatpush3.bf16.msra.mxu0 %v1359_v23 }
  0x23   : > { %1348 = vset.pattern.permute.xlu0 %v1379_v7  ;;  %1270 = vmatprep.subr.bf16.mxu0 %v1360_v24 }
  0x24   : > { %424 = vperm.xlu0 %1348, %v1444_v2  }
  0x25   : > { %532 = vperm.xlu1 %1337, %v285_v1  }
  0x26   : > { %1271 = vmatpush3.bf16.msra.mxu0 %v1360_v24 }
  0x27   : > { %1272 = vmatprep.subr.bf16.mxu0 %v1361_v25 }
  0x28   : > { %436 = vperm.xlu0 %1348, %v1448_v3  }
  0x29   : > { %536 = vperm.xlu1 %1337, %v1448_v3  }
  0x2a   : > { %1273 = vmatpush3.bf16.msra.mxu0 %v1361_v25 }
  0x2c   : > { %440 = vperm.xlu0 %1348, %v287_v10  }
  0x2d   : > { %1338 = vset.pattern.permute.xlu1 %v1381_v11 }
  0x2e   : > { %628 = vperm.xlu1 %1338, %v284_v4  }
  0x30   : > { %452 = vperm.xlu0 %1348, %v290_v12  }
  0x32   : > { %632 = vperm.xlu1 %1338, %v285_v1  }
  0x34   : > { %456 = vperm.xlu0 %1348, %v1475_v13  }
  0x36   : > { %1339 = vset.pattern.permute.xlu1 %v1378_v0 }
  0x37   : > { %323 = vperm.xlu1 %1339, %v287_v10  }
  0x38   : > { %468 = vperm.xlu0 %1348, %v1479_v14  }
  0x3b   : > { %333 = vperm.xlu1 %1339, %v289_v15  }
  0x3c   : > { %472 = vperm.xlu0 %1348, %v1485_v16  }
  0x3f   : > { %338 = vperm.xlu1 %1339, %v290_v12  }
  0x40   : > { %484 = vperm.xlu0 %1348, %v1492_v18  }
  0x43   : > { %1340 = vset.pattern.permute.xlu1 %v1379_v7 }
  0x44   : > { %444 = vperm.xlu1 %1340, %v1453_v5   ;;  %1350 = vset.pattern.permute.xlu0 %v1380_v9 }
  0x45   : > { %528 = vperm.xlu0 %1350, %v284_v4   ;;  %v589_v4 = vsub.s32 2, %v382_v52 }
  0x48   : > { %448 = vperm.xlu1 %1340, %v289_v15  }
  0x49   : > { %544 = vperm.xlu0 %1350, %v1453_v5  }
  0x4c   : > { %1341 = vset.pattern.permute.xlu1 %v1380_v9 }
  0x4d   : > { %540 = vperm.xlu1 %1341, %v287_v10   ;;  %560 = vperm.xlu0 %1350, %v1456_v6  }
  0x51   : > { %548 = vperm.xlu1 %1341, %v289_v15   ;;  %576 = vperm.xlu0 %1350, %v1462_v8  }
  0x55   : > { %552 = vperm.xlu1 %1341, %v290_v12   ;;  %1352 = vset.pattern.permute.xlu0 %v1381_v11 }
  0x56   : > { %624 = vperm.xlu0 %1352, %v1444_v2  }
  0x59   : > { %1342 = vset.pattern.permute.xlu1 %v1381_v11 }
  0x5a   : > { %644 = vperm.xlu1 %1342, %v1453_v5   ;;  %636 = vperm.xlu0 %1352, %v1448_v3   ;;  %v1610_v3 = vrot.slane %v299_v59, %v489_v61 }
  0x5e   : > { %648 = vperm.xlu1 %1342, %v289_v15   ;;  %640 = vperm.xlu0 %1352, %v287_v10  }
  0x62   : > { %1343 = vset.pattern.permute.xlu1 %v1378_v0  ;;  %652 = vperm.xlu0 %1352, %v290_v12   ;;  %v689_v12 = vsub.s32 3, %v382_v52 }
  0x63   : > { %343 = vperm.xlu1 %1343, %v1475_v13  }
  0x64   : > { %v1637_v23 = vrot.slane %v299_v59, %v689_v12 }
  0x66   : > { %656 = vperm.xlu0 %1352, %v1475_v13  }
  0x67   : > { %353 = vperm.xlu1 %1343, %v293_v26  }
  0x6a   : > { %668 = vperm.xlu0 %1352, %v1479_v14  }
  0x6b   : > { %358 = vperm.xlu1 %1343, %v1479_v14  }
  0x6e   : > { %672 = vperm.xlu0 %1352, %v1485_v16  }
  0x6f   : > { %1344 = vset.pattern.permute.xlu1 %v1379_v7 }
  0x70   : > { %460 = vperm.xlu1 %1344, %v1456_v6  }
  0x72   : > { %684 = vperm.xlu0 %1352, %v1492_v18  }
  0x74   : > { %464 = vperm.xlu1 %1344, %v293_v26  }
  0x78   : > { %1345 = vset.pattern.permute.xlu1 %v1380_v9 }
  0x79   : > { %556 = vperm.xlu1 %1345, %v1475_v13  }
  0x7d   : > { %564 = vperm.xlu1 %1345, %v293_v26  }
  0x81   : > { %568 = vperm.xlu1 %1345, %v1479_v14  }
  0x85   : > { %1346 = vset.pattern.permute.xlu1 %v1381_v11 }
  0x86   : > { %660 = vperm.xlu1 %1346, %v1456_v6  }
  0x8a   : > { %v1543_v27 = vpop.permute.xlu1 %313  ;;  %664 = vperm.xlu1 %1346, %v293_v26   ;;  %v304_v28 = vpop.permute.xlu0 %303 }
  0x8b   : > { %v385_v6 = vmul.f32 %v1604_v63, %v304_v28  ;;  %v387_v15 = vmul.f32 %v1604_v63, %v1543_v27 }
  0x8e   : > { %v1545_v29 = vpop.permute.xlu1 %318  ;;  %1347 = vset.pattern.permute.xlu1 %v1378_v0  ;;  %v309_v30 = vpop.permute.xlu0 %308  ;;  %v1365_v0 = vld [vmem:[%s1790_s5 + $0x20] sm:$0xff]  }
  0x8f   : > { %363 = vperm.xlu1 %1347, %v1485_v16   ;;  %v386_v2 = vmul.f32 %v1604_v63, %v309_v30  ;;  %1296 = vmatprep.subr.bf16.mxu1 %v1365_v0  ;;  %v388_v17 = vmul.f32 %v1604_v63, %v1545_v29 }
  0x90   : > { %1297 = vmatpush3.bf16.msra.mxu1 %v1365_v0 }
  0x92   : > { %v1550_v32 = vpop.permute.xlu0 %328 }
  0x93   : > { %v429_v33 = vpop.permute.xlu1 %428  ;;  %373 = vperm.xlu1 %1347, %v297_v31   ;;  %v390_v27 = vmul.f32 %v1604_v63, %v1550_v32 }
  0x94   : > { %v492_v10 = vmul.f32 %v1610_v3, %v429_v33 }
  0x96   : > { %v1552_v34 = vpop.permute.xlu0 %348 }
  0x97   : > { %v1554_v35 = vpop.permute.xlu1 %432  ;;  %378 = vperm.xlu1 %1347, %v1492_v18  }
  0x98   : > { %v493_v20 = vmul.f32 %v1610_v3, %v1554_v35 }
  0x9a   : > { %v1557_v36 = vpop.permute.xlu0 %368 }
  0x9b   : > { %1349 = vset.pattern.permute.xlu1 %v1379_v7  ;;  %v1366_v7 = vld [vmem:[%s1790_s5 + $0x18] sm:$0xff]  }
  0x9c   : > { %476 = vperm.xlu1 %1349, %v1462_v8   ;;  %v1561_v37 = vpop.permute.xlu1 %524  ;;  %1298 = vmatprep.subr.bf16.mxu1 %v1366_v7 }
  0x9d   : > { %1299 = vmatpush3.bf16.msra.mxu1 %v1366_v7 }
  0x9f   : > { %v425_v38 = vpop.permute.xlu0 %424 }
  0xa0   : > { %480 = vperm.xlu1 %1349, %v297_v31   ;;  %v1563_v39 = vpop.permute.xlu1 %532 }
  0xa3   : > { %v437_v40 = vpop.permute.xlu0 %436 }
  0xa4   : > { %1351 = vset.pattern.permute.xlu1 %v1380_v9  ;;  %v1566_v41 = vpop.permute.xlu1 %536  ;;  %v494_v22 = vmul.f32 %v1610_v3, %v437_v40 }
  0xa5   : > { %572 = vperm.xlu1 %1351, %v1485_v16  }
  0xa7   : > { %v1569_v42 = vpop.permute.xlu0 %440 }
  0xa9   : > { %580 = vperm.xlu1 %1351, %v297_v31   ;;  %v1571_v43 = vpop.permute.xlu1 %628 }
  0xaa   : > { %v692_v32 = vmul.f32 %v1637_v23, %v1571_v43 }
  0xab   : > { %v1573_v44 = vpop.permute.xlu0 %452 }
  0xad   : > { %584 = vperm.xlu1 %1351, %v1492_v18   ;;  %v1576_v45 = vpop.permute.xlu1 %632  ;;  %v491_v18 = vmul.f32 %v1610_v3, %v425_v38 }
  0xaf   : > { %v1578_v46 = vpop.permute.xlu0 %456 }
  0xb1   : > { %1353 = vset.pattern.permute.xlu1 %v1381_v11  ;;  %v1623_v11 = vrot.slane %v299_v59, %v589_v4 }
  0xb2   : > { %676 = vperm.xlu1 %1353, %v1462_v8   ;;  %v324_v47 = vpop.permute.xlu1 %323  ;;  %v1619_v8 = vld [vmem:[%s1787_s2] ss:$0 sm:$0xff] }
  0xb3   : > { %v1582_v48 = vpop.permute.xlu0 %468  ;;  %v408_v9 = vadd.f32 %v1619_v8, %v386_v2  ;;  %v407_v16 = vadd.f32 %v1619_v8, %v385_v6  ;;  %v409_v26 = vadd.f32 %v1619_v8, %v387_v15  ;;  %v410_v28 = vadd.f32 %v1619_v8, %v388_v17 }
  0xb4   : > { %v593_v30 = vmul.f32 %v1623_v11, %v1563_v39  ;;  %v389_v35 = vmul.f32 %v1604_v63, %v324_v47  ;;  %v591_v38 = vmul.f32 %v1623_v11, %v1561_v37  ;;  %v594_v49 = vmul.f32 %v1623_v11, %v1566_v41 }
  0xb5   : > { %v508_v21 = vadd.f32 %v492_v10, %v408_v9  ;;  %v507_v29 = vadd.f32 %v491_v18, %v407_v16  ;;  %v509_v33 = vadd.f32 %v493_v20, %v409_v26  ;;  %v510_v40 = vadd.f32 %v494_v22, %v410_v28 }
  0xb6   : > { %680 = vperm.xlu1 %1353, %v297_v31   ;;  %v1584_v50 = vpop.permute.xlu1 %333  ;;  %v412_v54 = vadd.f32 %v1619_v8, %v390_v27  ;;  %v693_v39 = vmul.f32 %v1637_v23, %v1576_v45  ;;  %v495_v41 = vmul.f32 %v1610_v3, %v1569_v42  ;;  %v411_v61 = vadd.f32 %v1619_v8, %v389_v35 }
  0xb7   : > { %v1586_v51 = vpop.permute.xlu0 %472  ;;  %v609_v47 = vadd.f32 %v593_v30, %v509_v33  ;;  %v607_v37 = vadd.f32 %v591_v38, %v507_v29  ;;  %v391_v43 = vmul.f32 %v1604_v63, %v1584_v50  ;;  %v610_v45 = vadd.f32 %v594_v49, %v510_v40 }
  0xb8   : > { %v511_v17 = vadd.f32 %v495_v41, %v411_v61 }
  0xb9   : > { %v709_v2 = vadd.f32 %v693_v39, %v609_v47 }
  0xba   : > { %v1588_v53 = vpop.permute.xlu1 %338 }
  0xbb   : > { %v1596_v56 = vpop.permute.xlu0 %484  ;;  %v725_v20 = vmax.f32 %v709_v2, 0.0 }
  0xbf   : > { %v445_v60 = vpop.permute.xlu1 %444 }
  0xc0   : > { %v529_v62 = vpop.permute.xlu0 %528  ;;  %v496_v55 = vmul.f32 %v1610_v3, %v445_v60 }
  0xc1   : > { %v592_v19 = vmul.f32 %v1623_v11, %v529_v62  ;;  %v392_v62 = vmul.f32 %v1604_v63, %v1588_v53  ;;  %v498_v53 = vmul.f32 %v1610_v3, %v1573_v44 }
  0xc2   : > { %v512_v4 = vadd.f32 %v496_v55, %v412_v54 }
  0xc3   : > { %v449_v1 = vpop.permute.xlu1 %448  ;;  %v608_v31 = vadd.f32 %v592_v19, %v508_v21  ;;  %v414_v16 = vadd.f32 %v1619_v8, %v392_v62 }
  0xc4   : > { %v545_v5 = vpop.permute.xlu0 %544  ;;  %v497_v6 = vmul.f32 %v1610_v3, %v449_v1 }
  0xc5   : > { %v708_v59 = vadd.f32 %v692_v32, %v608_v31  ;;  %v596_v60 = vmul.f32 %v1623_v11, %v545_v5  ;;  %v413_v5 = vadd.f32 %v1619_v8, %v391_v43  ;;  %v514_v33 = vadd.f32 %v498_v53, %v414_v16 }
  0xc7   : > { %v724_v15 = vmax.f32 %v708_v59, 0.0  ;;  %v612_v18 = vadd.f32 %v596_v60, %v512_v4  ;;  %v513_v21 = vadd.f32 %v497_v6, %v413_v5  ;;  %v394_v4 = vmul.f32 %v1604_v63, %v1552_v34 }
  0xc8   : > { %v541_v13 = vpop.permute.xlu1 %540  ;;  %v1625_v14 = vpop.permute.xlu0 %560  ;;  %v502_v34 = vmul.f32 %v1610_v3, %v1582_v48 }
  0xc9   : > { %v595_v7 = vmul.f32 %v1623_v11, %v541_v13 }
  0xcb   : > { %v611_v22 = vadd.f32 %v595_v7, %v511_v17  ;;  %v600_v17 = vmul.f32 %v1623_v11, %v1625_v14 }
  0xcc   : > { %v549_v24 = vpop.permute.xlu1 %548  ;;  %v1639_v25 = vpop.permute.xlu0 %576 }
  0xcd   : > { %v597_v1 = vmul.f32 %v1623_v11, %v549_v24 }
  0xcf   : > { %v613_v35 = vadd.f32 %v597_v1, %v513_v21 }
  0xd0   : > { %v553_v52 = vpop.permute.xlu1 %552 }
  0xd1   : > { %v625_v57 = vpop.permute.xlu0 %624  ;;  %v598_v26 = vmul.f32 %v1623_v11, %v553_v52 }
  0xd2   : > { %v691_v58 = vmul.f32 %v1637_v23, %v625_v57 }
  0xd3   : > { %v614_v40 = vadd.f32 %v598_v26, %v514_v33 }
  0xd4   : > { %v707_v0 = vadd.f32 %v691_v58, %v607_v37 }
  0xd5   : > { %v645_v9 = vpop.permute.xlu1 %644  ;;  %v637_v42 = vpop.permute.xlu0 %636 }
  0xd6   : > { %v696_v10 = vmul.f32 %v1637_v23, %v645_v9  ;;  %v694_v12 = vmul.f32 %v1637_v23, %v637_v42  ;;  %v723_v50 = vmax.f32 %v707_v0, 0.0  ;;  %v499_v0 = vmul.f32 %v1610_v3, %v1578_v46 }
  0xd8   : > { %v710_v13 = vadd.f32 %v694_v12, %v610_v45  ;;  %v739_v19 = vpack.c.bf16 %v724_v15, %v723_v50  ;;  %v712_v29 = vadd.f32 %v696_v10, %v612_v18  ;;  %v416_v50 = vadd.f32 %v1619_v8, %v394_v4 }
  0xd9   : > { %v649_v27 = vpop.permute.xlu1 %648  ;;  %v641_v28 = vpop.permute.xlu0 %640 }
  0xda   : > { %v726_v30 = vmax.f32 %v710_v13, 0.0  ;;  %v697_v44 = vmul.f32 %v1637_v23, %v649_v27  ;;  %v695_v31 = vmul.f32 %v1637_v23, %v641_v28  ;;  %1274 = vmatprep.mubr.bf16.mxu0 %v739_v19  ;;  %v728_v32 = vmax.f32 %v712_v29, 0.0 }
  0xdc   : > { %v711_v38 = vadd.f32 %v695_v31, %v611_v22  ;;  %v740_v24 = vpack.c.bf16 %v726_v30, %v725_v20  ;;  %v713_v54 = vadd.f32 %v697_v44, %v613_v35 }
  0xdd   : > { %v653_v49 = vpop.permute.xlu0 %652 }
  0xde   : > { %v727_v39 = vmax.f32 %v711_v38, 0.0  ;;  %v698_v52 = vmul.f32 %v1637_v23, %v653_v49  ;;  %v344_v55 = vpop.permute.xlu1 %343  ;;  %1275 = vmatmul.mubr.bf16.vlgmr.msra.gmra.mxu0 %v740_v24  ;;  %v729_v58 = vmax.f32 %v713_v54, 0.0 }
  0xdf   : > { %v393_v45 = vmul.f32 %v1604_v63, %v344_v55 }
  0xe0   : > { %v714_v57 = vadd.f32 %v698_v52, %v614_v40  ;;  %v741_v47 = vpack.c.bf16 %v728_v32, %v727_v39 }
  0xe1   : > { %v415_v2 = vadd.f32 %v1619_v8, %v393_v45  ;;  %v657_v10 = vpop.permute.xlu0 %656 }
  0xe2   : > { %v730_v37 = vmax.f32 %v714_v57, 0.0  ;;  %v354_v59 = vpop.permute.xlu1 %353  ;;  %1278 = vmatprep.mubr.bf16.mxu0 %v741_v47  ;;  %v699_v16 = vmul.f32 %v1637_v23, %v657_v10 }
  0xe3   : > { %v515_v12 = vadd.f32 %v499_v0, %v415_v2  ;;  %v395_v46 = vmul.f32 %v1604_v63, %v354_v59 }
  0xe4   : > { %v742_v41 = vpack.c.bf16 %v730_v37, %v729_v58  ;;  %v398_v58 = vmul.f32 %v1604_v63, %v1557_v36  ;;  %v1368_v36 = vld [vmem:[%s1790_s5 + $0x8] sm:$0xff]  }
  0xe5   : > { %v669_v13 = vpop.permute.xlu0 %668  ;;  %v417_v21 = vadd.f32 %v1619_v8, %v395_v46  ;;  %v506_v46 = vmul.f32 %v1610_v3, %v1596_v56 }
  0xe6   : > { %v359_v61 = vpop.permute.xlu1 %358  ;;  %1279 = vmatmul.mubr.bf16.gmra.mxu0 %v742_v41  ;;  %v702_v26 = vmul.f32 %v1637_v23, %v669_v13  ;;  %v420_v59 = vadd.f32 %v1619_v8, %v398_v58 }
  0xe7   : > { %v396_v6 = vmul.f32 %v1604_v63, %v359_v61  ;;  %v604_v61 = vmul.f32 %v1623_v11, %v1639_v25 }
  0xe9   : > { %v418_v15 = vadd.f32 %v1619_v8, %v396_v6  ;;  %v673_v10 = vpop.permute.xlu0 %672 }
  0xeb   : > { %v461_v43 = vpop.permute.xlu1 %460  ;;  %v518_v20 = vadd.f32 %v502_v34, %v418_v15 }
  0xec   : > { %v500_v42 = vmul.f32 %v1610_v3, %v461_v43 }
  0xee   : > { %v516_v18 = vadd.f32 %v500_v42, %v416_v50  ;;  %v1369_v42 = vld [vmem:[%s1790_s5] sm:$0xff]  }
  0xef   : > { %v465_v62 = vpop.permute.xlu1 %464 }
  0xf0   : > { %v501_v19 = vmul.f32 %v1610_v3, %v465_v62  ;;  %v616_v48 = vadd.f32 %v600_v17, %v516_v18  ;;  %v685_v18 = vpop.permute.xlu0 %684 }
  0xf1   : > { %v706_v56 = vmul.f32 %v1637_v23, %v685_v18 }
  0xf2   : > { %v517_v14 = vadd.f32 %v501_v19, %v417_v21 }
  0xf4   : > { %v557_v60 = vpop.permute.xlu1 %556 }
  0xf5   : > { %v599_v9 = vmul.f32 %v1623_v11, %v557_v60  ;;  %v1367_v60 = vld [vmem:[%s1790_s5 + $0x10] sm:$0xff]  }
  0xf6   : > { %1300 = vmatprep.subr.bf16.mxu1 %v1367_v60 }
  0xf7   : > { %v615_v5 = vadd.f32 %v599_v9, %v515_v12  ;;  %1301 = vmatpush3.bf16.msra.mxu1 %v1367_v60 }
  0xf8   : > { %v565_v7 = vpop.permute.xlu1 %564  ;;  %1302 = vmatprep.subr.bf16.mxu1 %v1368_v36 }
  0xf9   : > { %v715_v22 = vadd.f32 %v699_v16, %v615_v5  ;;  %v601_v28 = vmul.f32 %v1623_v11, %v565_v7  ;;  %v503_v7 = vmul.f32 %v1610_v3, %v1586_v51  ;;  %v703_v16 = vmul.f32 %v1637_v23, %v673_v10 }
  0xfb   : > { %v731_v31 = vmax.f32 %v715_v22, 0.0  ;;  %v617_v35 = vadd.f32 %v601_v28, %v517_v14  ;;  %1303 = vmatpush3.bf16.msra.mxu1 %v1368_v36 }
  0xfc   : > { %v569_v53 = vpop.permute.xlu1 %568  ;;  %1304 = vmatprep.subr.bf16.mxu1 %v1369_v42 }
  0xfd   : > { %v602_v1 = vmul.f32 %v1623_v11, %v569_v53 }
  0xff   : > { %v618_v29 = vadd.f32 %v602_v1, %v518_v20  ;;  %1305 = vmatpush3.bf16.msra.mxu1 %v1369_v42 }
 0x101   : > { %v661_v27 = vpop.permute.xlu1 %660  ;;  %v718_v38 = vadd.f32 %v702_v26, %v618_v29 }
 0x102   : > { %v700_v30 = vmul.f32 %v1637_v23, %v661_v27 }
 0x103   : > { %v734_v54 = vmax.f32 %v718_v38, 0.0  ;;  %v1206_v38 = vld [vmem:[%s1789_s4] ss:$0 sm:$0xff] }
 0x104   : > { %v716_v44 = vadd.f32 %v700_v30, %v616_v48 }
 0x105   : > { %v665_v33 = vpop.permute.xlu1 %664 }
 0x106   : > { %v732_v24 = vmax.f32 %v716_v44, 0.0  ;;  %v701_v40 = vmul.f32 %v1637_v23, %v665_v33 }
 0x108   : > { %v717_v49 = vadd.f32 %v701_v40, %v617_v35  ;;  %v743_v32 = vpack.c.bf16 %v732_v24, %v731_v31 }
 0x10a   : > { %v733_v39 = vmax.f32 %v717_v49, 0.0  ;;  %v364_v52 = vpop.permute.xlu1 %363  ;;  %1282 = vmatprep.mubr.bf16.mxu0 %v743_v32 }
 0x10b   : > { %v397_v0 = vmul.f32 %v1604_v63, %v364_v52 }
 0x10c   : > { %v744_v55 = vpack.c.bf16 %v734_v54, %v733_v39 }
 0x10d   : > { %v419_v4 = vadd.f32 %v1619_v8, %v397_v0 }
 0x10e   : > { %v374_v57 = vpop.permute.xlu1 %373  ;;  %1283 = vmatmul.mubr.bf16.gmra.mxu0 %v744_v55 }
 0x10f   : > { %v519_v12 = vadd.f32 %v503_v7, %v419_v4  ;;  %v399_v51 = vmul.f32 %v1604_v63, %v374_v57 }
 0x111   : > { %v421_v19 = vadd.f32 %v1619_v8, %v399_v51 }
 0x112   : > { %v379_v47 = vpop.permute.xlu1 %378 }
 0x113   : > { %v400_v25 = vmul.f32 %v1604_v63, %v379_v47 }
 0x115   : > { %v422_v50 = vadd.f32 %v1619_v8, %v400_v25 }
 0x117   : > { %v477_v37 = vpop.permute.xlu1 %476  ;;  %v522_v17 = vadd.f32 %v506_v46, %v422_v50 }
 0x118   : > { %v504_v41 = vmul.f32 %v1610_v3, %v477_v37 }
 0x11a   : > { %v520_v43 = vadd.f32 %v504_v41, %v420_v59 }
 0x11b   : > { %v481_v62 = vpop.permute.xlu1 %480 }
 0x11c   : > { %v620_v45 = vadd.f32 %v604_v61, %v520_v43  ;;  %v505_v34 = vmul.f32 %v1610_v3, %v481_v62 }
 0x11e   : > { %v521_v63 = vadd.f32 %v505_v34, %v421_v19 }
 0x120   : > { %v573_v2 = vpop.permute.xlu1 %572 }
 0x121   : > { %v603_v9 = vmul.f32 %v1623_v11, %v573_v2 }
 0x123   : > { %v619_v53 = vadd.f32 %v603_v9, %v519_v12 }
 0x124   : > { %v581_v6 = vpop.permute.xlu1 %580 }
 0x125   : > { %v719_v1 = vadd.f32 %v703_v16, %v619_v53  ;;  %v605_v20 = vmul.f32 %v1623_v11, %v581_v6 }
 0x127   : > { %v735_v27 = vmax.f32 %v719_v1, 0.0  ;;  %v621_v29 = vadd.f32 %v605_v20, %v521_v63 }
 0x128   : > { %v585_v15 = vpop.permute.xlu1 %584 }
 0x129   : > { %v606_v5 = vmul.f32 %v1623_v11, %v585_v15 }
 0x12b   : > { %v622_v21 = vadd.f32 %v606_v5, %v522_v17 }
 0x12d   : > { %v677_v13 = vpop.permute.xlu1 %676  ;;  %v722_v48 = vadd.f32 %v706_v56, %v622_v21 }
 0x12e   : > { %v704_v22 = vmul.f32 %v1637_v23, %v677_v13 }
 0x12f   : > { %v738_v31 = vmax.f32 %v722_v48, 0.0 }
 0x130   : > { %v720_v26 = vadd.f32 %v704_v22, %v620_v45 }
 0x131   : > { %v681_v28 = vpop.permute.xlu1 %680 }
 0x132   : > { %v736_v3 = vmax.f32 %v720_v26, 0.0  ;;  %v705_v30 = vmul.f32 %v1637_v23, %v681_v28 }
 0x134   : > { %v721_v14 = vadd.f32 %v705_v30, %v621_v29  ;;  %v745_v44 = vpack.c.bf16 %v736_v3, %v735_v27  ;;  %v1223_v3 = vld [vmem:[%s1791_s6] ss:$0 sm:$0xff] }
 0x136   : > { %v737_v8 = vmax.f32 %v721_v14, 0.0  ;;  %1286 = vmatprep.mubr.bf16.mxu0 %v745_v44 }
 0x138   : > { %v746_v11 = vpack.c.bf16 %v738_v31, %v737_v8 }
 0x13a   : > { %1287 = vmatmul.mubr.bf16.gmra.mxu0 %v746_v11 }
 0x19e   : > { %v1276_v33 = vpop.f32.mrf.mxu0 }
 0x19f   : > { %v861_v32 = vadd.f32 %v1276_v33, %v1206_v38 }
 0x1a0   : > { %v852_v35 = vpop.f32.mrf.mxu0 }
 0x1a1   : > { %v853_v40 = vadd.f32 %v1206_v38, %v852_v35  ;;  %v917_v47 = vmax.f32 %v861_v32, 0.0 }
 0x1a2   : > { %v1277_v24 = vpop.f32.mrf.mxu0 }
 0x1a3   : > { %v864_v49 = vadd.f32 %v1277_v24, %v1206_v38  ;;  %v915_v55 = vmax.f32 %v853_v40, 0.0 }
 0x1a4   : > { %v855_v54 = vpop.f32.mrf.mxu0 }
 0x1a5   : > { %v856_v39 = vadd.f32 %v1206_v38, %v855_v54  ;;  %v918_v23 = vmax.f32 %v864_v49, 0.0 }
 0x1a6   : > { %v1280_v52 = vpop.f32.mrf.mxu0 }
 0x1a7   : > { %v916_v57 = vmax.f32 %v856_v39, 0.0  ;;  %v932_v59 = vpack.c.bf16 %v918_v23, %v917_v47  ;;  %v877_v62 = vadd.f32 %v1280_v52, %v1206_v38 }
 0x1a8   : > { %v868_v58 = vpop.f32.mrf.mxu0 }
 0x1a9   : > { %v931_v37 = vpack.c.bf16 %v916_v57, %v915_v55  ;;  %v869_v61 = vadd.f32 %v1206_v38, %v868_v58  ;;  %v921_v4 = vmax.f32 %v877_v62, 0.0 }
 0x1aa   : > { %v1281_v41 = vpop.f32.mrf.mxu0 }
 0x1ab   : > { %v880_v43 = vadd.f32 %v1281_v41, %v1206_v38  ;;  %1306 = vmatprep.mubr.bf16.mxu1 %v931_v37  ;;  %v919_v2 = vmax.f32 %v869_v61, 0.0 }
 0x1ac   : > { %v871_v45 = vpop.f32.mrf.mxu0  ;;  %1307 = vmatmul.mubr.bf16.vlgmr.msra.gmra.mxu1 %v932_v59 }
 0x1ad   : > { %v872_v60 = vadd.f32 %v1206_v38, %v871_v45  ;;  %v922_v0 = vmax.f32 %v880_v43, 0.0 }
 0x1af   : > { %v920_v36 = vmax.f32 %v872_v60, 0.0  ;;  %v934_v6 = vpack.c.bf16 %v922_v0, %v921_v4 }
 0x1b1   : > { %v933_v25 = vpack.c.bf16 %v920_v36, %v919_v2 }
 0x1b3   : > { %1310 = vmatprep.mubr.bf16.mxu1 %v933_v25 }
 0x1b4   : > { %1311 = vmatmul.mubr.bf16.gmra.mxu1 %v934_v6 }
 0x1ce   : > { %v1284_v7 = vpop.f32.mrf.mxu0 }
 0x1cf   : > { %v893_v50 = vadd.f32 %v1284_v7, %v1206_v38 }
 0x1d0   : > { %v884_v9 = vpop.f32.mrf.mxu0 }
 0x1d1   : > { %v885_v10 = vadd.f32 %v1206_v38, %v884_v9  ;;  %v925_v16 = vmax.f32 %v893_v50, 0.0 }
 0x1d2   : > { %v1285_v42 = vpop.f32.mrf.mxu0 }
 0x1d3   : > { %v896_v12 = vadd.f32 %v1285_v42, %v1206_v38  ;;  %v923_v51 = vmax.f32 %v885_v10, 0.0 }
 0x1d4   : > { %v887_v15 = vpop.f32.mrf.mxu0 }
 0x1d5   : > { %v888_v53 = vadd.f32 %v1206_v38, %v887_v15  ;;  %v926_v46 = vmax.f32 %v896_v12, 0.0 }
 0x1d7   : > { %v924_v5 = vmax.f32 %v888_v53, 0.0  ;;  %v936_v17 = vpack.c.bf16 %v926_v46, %v925_v16 }
 0x1d9   : > { %v935_v34 = vpack.c.bf16 %v924_v5, %v923_v51 }
 0x1db   : > { %1314 = vmatprep.mubr.bf16.mxu1 %v935_v34 }
 0x1dc   : > { %1315 = vmatmul.mubr.bf16.gmra.mxu1 %v936_v17 }
 0x1fa   : > { %v1288_v18 = vpop.f32.mrf.mxu0 }
 0x1fb   : > { %v909_v21 = vadd.f32 %v1288_v18, %v1206_v38 }
 0x1fc   : > { %v900_v1 = vpop.f32.mrf.mxu0 }
 0x1fd   : > { %v901_v19 = vadd.f32 %v1206_v38, %v900_v1  ;;  %v929_v28 = vmax.f32 %v909_v21, 0.0 }
 0x1fe   : > { %v1289_v13 = vpop.f32.mrf.mxu0 }
 0x1ff   : > { %v912_v20 = vadd.f32 %v1289_v13, %v1206_v38  ;;  %v927_v26 = vmax.f32 %v901_v19, 0.0 }
 0x200   : > { %v903_v22 = vpop.f32.mrf.mxu0 }
 0x201   : > { %v904_v56 = vadd.f32 %v1206_v38, %v903_v22  ;;  %v930_v63 = vmax.f32 %v912_v20, 0.0 }
 0x203   : > { %v928_v27 = vmax.f32 %v904_v56, 0.0  ;;  %v938_v48 = vpack.c.bf16 %v930_v63, %v929_v28 }
 0x205   : > { %v937_v29 = vpack.c.bf16 %v928_v27, %v927_v26 }
 0x207   : > { %1318 = vmatprep.mubr.bf16.mxu1 %v937_v29 }
 0x208   : > { %1319 = vmatmul.mubr.bf16.gmra.mxu1 %v938_v48 }
 0x26c   : > { %v1308_v30 = vpop.f32.mrf.mxu1 }
 0x26d   : > { %v1109_v14 = vadd.f32 %v1308_v30, %v1223_v3 }
 0x26e   : > { %v1037_v44 = vpop.f32.mrf.mxu1 }
 0x26f   : > { %1126 = vst.msk [vmem:[%s1748_s10 + $0x10] sm:$0xff] %vm1123_vm0, %v1109_v14  ;;  %v1107_v31 = vadd.f32 %v1223_v3, %v1037_v44 }
 0x270   : > { %v1309_v8 = vpop.f32.mrf.mxu1 }
 0x271   : > { %1124 = vst.msk [vmem:[%s1748_s10] sm:$0xff] %vm1123_vm0, %v1107_v31  ;;  %v1110_v11 = vadd.f32 %v1309_v8, %v1223_v3 }
 0x272   : > { %v1040_v33 = vpop.f32.mrf.mxu1 }
 0x273   : > { %1127 = vst.msk [vmem:[%s1748_s10 + $0x18] sm:$0xff] %vm1123_vm0, %v1110_v11  ;;  %v1108_v35 = vadd.f32 %v1223_v3, %v1040_v33 }
 0x274   : > { %v1312_v38 = vpop.f32.mrf.mxu1 }
 0x275   : > { %1125 = vst.msk [vmem:[%s1748_s10 + $0x8] sm:$0xff] %vm1123_vm0, %v1108_v35  ;;  %v1113_v24 = vadd.f32 %v1312_v38, %v1223_v3 }
 0x276   : > { %v1053_v40 = vpop.f32.mrf.mxu1 }
 0x277   : > { %1130 = vst.msk [vmem:[%s1748_s10 + $0x30] sm:$0xff] %vm1123_vm0, %v1113_v24  ;;  %v1111_v49 = vadd.f32 %v1223_v3, %v1053_v40 }
 0x278   : > { %v1313_v32 = vpop.f32.mrf.mxu1 }
 0x279   : > { %1128 = vst.msk [vmem:[%s1748_s10 + $0x20] sm:$0xff] %vm1123_vm0, %v1111_v49  ;;  %v1114_v54 = vadd.f32 %v1313_v32, %v1223_v3 }
 0x27a   : > { %v1056_v39 = vpop.f32.mrf.mxu1 }
 0x27b   : > { %1131 = vst.msk [vmem:[%s1748_s10 + $0x38] sm:$0xff] %vm1123_vm0, %v1114_v54  ;;  %v1112_v23 = vadd.f32 %v1223_v3, %v1056_v39 }
 0x27d   : > { %1129 = vst.msk [vmem:[%s1748_s10 + $0x28] sm:$0xff] %vm1123_vm0, %v1112_v23 }
 0x29c   : > { %v1316_v52 = vpop.f32.mrf.mxu1 }
 0x29d   : > { %v1117_v55 = vadd.f32 %v1316_v52, %v1223_v3 }
 0x29e   : > { %v1069_v57 = vpop.f32.mrf.mxu1 }
 0x29f   : > { %1134 = vst.msk [vmem:[%s1748_s10 + $0x50] sm:$0xff] %vm1123_vm0, %v1117_v55  ;;  %v1115_v47 = vadd.f32 %v1223_v3, %v1069_v57 }
 0x2a0   : > { %v1317_v58 = vpop.f32.mrf.mxu1 }
 0x2a1   : > { %1132 = vst.msk [vmem:[%s1748_s10 + $0x40] sm:$0xff] %vm1123_vm0, %v1115_v47  ;;  %v1118_v37 = vadd.f32 %v1317_v58, %v1223_v3 }
 0x2a2   : > { %v1072_v59 = vpop.f32.mrf.mxu1 }
 0x2a3   : > { %1135 = vst.msk [vmem:[%s1748_s10 + $0x58] sm:$0xff] %vm1123_vm0, %v1118_v37  ;;  %v1116_v41 = vadd.f32 %v1223_v3, %v1072_v59 }
 0x2a5   : > { %1133 = vst.msk [vmem:[%s1748_s10 + $0x48] sm:$0xff] %vm1123_vm0, %v1116_v41 }
 0x2c8   : > { %v1320_v61 = vpop.f32.mrf.mxu1 }
 0x2c9   : > { %v1121_v43 = vadd.f32 %v1320_v61, %v1223_v3 }
 0x2ca   : > { %v1085_v62 = vpop.f32.mrf.mxu1 }
 0x2cb   : > { %1138 = vst.msk [vmem:[%s1748_s10 + $0x70] sm:$0xff] %vm1123_vm0, %v1121_v43  ;;  %v1119_v45 = vadd.f32 %v1223_v3, %v1085_v62 }
 0x2cc   : > { %v1321_v60 = vpop.f32.mrf.mxu1 }
 0x2cd   : > { %1136 = vst.msk [vmem:[%s1748_s10 + $0x60] sm:$0xff] %vm1123_vm0, %v1119_v45  ;;  %v1122_v0 = vadd.f32 %v1321_v60, %v1223_v3 }
 0x2ce   : > { %v1088_v2 = vpop.f32.mrf.mxu1 }
 0x2cf   : > { %1139 = vst.msk [vmem:[%s1748_s10 + $0x78] sm:$0xff] %vm1123_vm0, %v1122_v0  ;;  %v1120_v36 = vadd.f32 %v1223_v3, %v1088_v2 }
 0x2d1   : > { %1137 = vst.msk [vmem:[%s1748_s10 + $0x68] sm:$0xff] %vm1123_vm0, %v1120_v36 }
 0x2d2 PF: > { %s17_s24 = sadd.s32 1, %s1376_s24  }
 0x2d3   : > { %p14_p4 = scmp.ge.s32.totalorder %s17_s24, 4  }
 0x2d5   :  { %16 = sbr.rel (!%p14_p4) target bundleno = 1 (0x1), region = 78 }

</bundles_post_ra>
